<compile_context>
chip_gen: v5e
topology: v5e:2x2
jax: 0.10.0
libtpu: 0.0.40
codegen_flags: <defaults>
</compile_context>

<pallas_src>
import math
import jax
import jax.numpy as jnp
from jax.experimental import pallas as pl
from jax.experimental.pallas import tpu as pltpu


def gcn_layer1_kernel(a_ref, vt_ref, w_ref, o_ref):
    # a_ref : (block_c, C)        row tile of A
    # vt_ref: (C, B*D)            batch-folded v  (vt[k, b*D + d] = v[b, k, d])
    # w_ref : (D, F_pad)          weights, zero-padded to a lane-dense feature dim
    # o_ref : (B, block_c, F_pad) f32 output tile
    block_c = a_ref.shape[0]
    D, F_pad = w_ref.shape
    B = vt_ref.shape[1] // D

    # Matmul 1: batch folded into the MXU N dimension -> one (block_c, C) x (C, B*D)
    # call with f32 accumulation.
    h = jnp.dot(a_ref[...], vt_ref[...],
                preferred_element_type=jnp.float32)            # (block_c, B*D), f32

    # Matmul 2 + LeakyReLU epilogue.  B is small, so a static unrolled loop keeps
    # everything as plain 2-D MXU calls (no value reshapes Mosaic has to relayout).
    for b in range(B):
        hb = h[:, b * D:(b + 1) * D].astype(w_ref.dtype)       # (block_c, D)
        yb = jnp.dot(hb, w_ref[...],
                     preferred_element_type=jnp.float32)       # (block_c, F_pad), f32
        # LeakyReLU, negative_slope = 0.01 (padded columns are exactly 0 either way).
        o_ref[b] = jnp.where(yb > 0, yb, 0.01 * yb).astype(o_ref.dtype)


def _pick_block_c(C, target=512):
    """Largest row tile <= target that divides C (multiple of 8 when actually tiling)."""
    if C <= target:
        return C
    for bc in range(target - target % 8, 7, -8):
        if C % bc == 0:
            return bc
    return C  # fall back to a single full tile


def gcn_layer1(A, W, v, *, block_c=None, use_bf16=True):
    """Pallas implementation of GCNLayer1.forward (bias=False)."""
    B, C, D = v.shape
    F = W.shape[1]
    assert A.shape == (C, C) and W.shape[0] == D

    F_pad = ((F + 127) // 128) * 128           # lane-dense output feature dim
    if block_c is None:
        block_c = _pick_block_c(C)
    assert C % block_c == 0, "block_c must divide C"

    in_dtype = jnp.bfloat16 if use_bf16 else v.dtype

    # Wrapper-side layout plumbing (no extra compute in the kernel):
    #   v_t[k, b*D + d] = v[b, k, d]  -> batch folded into matmul-1's N dimension
    v_t = jnp.transpose(v, (1, 0, 2)).reshape(C, B * D).astype(in_dtype)
    W_pad = W if F == F_pad else jnp.pad(W, ((0, 0), (0, F_pad - F)))
    W_pad = W_pad.astype(in_dtype)
    A_in = A.astype(in_dtype)

    grid = (C // block_c,)
    isz = jnp.dtype(in_dtype).itemsize
    # Rough VMEM budget: double-buffered inputs/output tile + f32 intermediates.
    vmem_est = (2 * (block_c * C * isz + C * B * D * isz + D * F_pad * isz
                     + B * block_c * F_pad * 4)
                + 4 * block_c * B * (D + F_pad))
    vmem_limit = int(min(max(2 * vmem_est, 16 * 1024 * 1024), 48 * 1024 * 1024))

    cost = pl.CostEstimate(
        flops=2 * B * C * C * D + 2 * B * C * D * F_pad,
        transcendentals=0,
        bytes_accessed=int((A_in.size + v_t.size + W_pad.size) * isz
                           + B * C * F_pad * 4),
    )

    out = pl.pallas_call(
        gcn_layer1_kernel,
        out_shape=jax.ShapeDtypeStruct((B, C, F_pad), jnp.float32),
        grid=grid,
        in_specs=[
            pl.BlockSpec((block_c, C), lambda i: (i, 0)),     # row tile of A
            pl.BlockSpec((C, B * D), lambda i: (0, 0)),       # batch-folded v (grid-invariant)
            pl.BlockSpec((D, F_pad), lambda i: (0, 0)),       # padded W (grid-invariant)
        ],
        out_specs=pl.BlockSpec((B, block_c, F_pad), lambda i: (0, i, 0)),
        compiler_params=pltpu.CompilerParams(
            dimension_semantics=("parallel",),                # row tiles are independent
            vmem_limit_bytes=vmem_limit,
        ),
        cost_estimate=cost,
    )(A_in, v_t, W_pad)

    return out if F == F_pad else out[:, :, :F]


def init_params(key, v_C, v_D, output_features):
    """Deterministic re-implementation of GCNLayer1.reset_parameters (bias=False)."""
    k_a, k_w = jax.random.split(key)
    std_a = 1.0 / math.sqrt(v_C)                 # A.size(1) == v_C
    std_w = 1.0 / math.sqrt(output_features)     # weights.size(1) == output_features
    A = jax.random.uniform(k_a, (v_C, v_C), jnp.float32, minval=-std_a, maxval=std_a)
    W = jax.random.uniform(k_w, (v_D, output_features), jnp.float32,
                           minval=-std_w, maxval=std_w)
    return A, W


def reference(A, W, v, compute_dtype=jnp.float32):
    """Pure-JAX reference.  compute_dtype=bfloat16 mirrors the kernel's MXU input
    precision (f32 accumulation either way); float32 matches the PyTorch module."""
    A = A.astype(compute_dtype)
    W = W.astype(compute_dtype)
    v = v.astype(compute_dtype)
    h = jnp.einsum('ck,bkd->bcd', A, v, preferred_element_type=jnp.float32)
    y = jnp.einsum('bcd,df->bcf', h.astype(compute_dtype), W,
                   preferred_element_type=jnp.float32)
    return jnp.where(y > 0, y, 0.01 * y)


if __name__ == "__main__":
    key = jax.random.PRNGKey(0)
    k_param, k_v = jax.random.split(key)

    B, v_C, v_D, out_features = 2, 8, 32, 16
    A, W = init_params(k_param, v_C, v_D, out_features)
    v = jax.random.normal(k_v, (B, v_C, v_D), jnp.float32)

    out = jax.block_until_ready(gcn_layer1(A, W, v))
    assert out.shape == (B, v_C, out_features)

    # Tight check vs. a reference using the same bf16-input / f32-accumulation recipe.
    ref_bf16 = reference(A, W, v, compute_dtype=jnp.bfloat16)
    assert jnp.allclose(out, ref_bf16, atol=1e-3, rtol=1e-3), "mismatch vs bf16 reference"

    # Loose check vs. the full-f32 PyTorch-equivalent reference (bf16 MXU inputs).
    ref_f32 = reference(A, W, v, compute_dtype=jnp.float32)
    assert jnp.allclose(out, ref_f32, atol=5e-2, rtol=5e-2), "mismatch vs f32 reference"

    print("KERNEL_OK")
</pallas_src>

<mosaic_0001>
module attributes {stable_mosaic.version = 11 : i64} {
  func.func @gcn_layer1_kernel(%arg0: i32, %arg1: memref<8x8xbf16, #tpu.memory_space<vmem>>, %arg2: memref<8x64xbf16, #tpu.memory_space<vmem>>, %arg3: memref<32x128xbf16, #tpu.memory_space<vmem>>, %arg4: memref<2x8x128xf32, #tpu.memory_space<vmem>>) attributes {dimension_semantics = [#tpu.dimension_semantics<parallel>], iteration_bounds = array<i64: 1>, scalar_prefetch = 0 : i64, scratch_operands = 0 : i64, tpu.core_type = #tpu.core_type<tc>, window_params = [{transform_indices = @transform_0, window_bounds = array<i64: 8, 8>}, {pipeline_mode = #tpu.pipeline_mode<synchronous>, transform_indices = @transform_1, window_bounds = array<i64: 8, 64>}, {pipeline_mode = #tpu.pipeline_mode<synchronous>, transform_indices = @transform_2, window_bounds = array<i64: 32, 128>}, {transform_indices = @transform_3, window_bounds = array<i64: 2, 8, 128>}]} {
    %c0 = arith.constant 0 : index
    %c0_0 = arith.constant 0 : index
    %0 = vector.load %arg1[%c0, %c0_0] : memref<8x8xbf16, #tpu.memory_space<vmem>>, vector<8x8xbf16>
    %c0_1 = arith.constant 0 : index
    %c0_2 = arith.constant 0 : index
    %1 = vector.load %arg2[%c0_1, %c0_2] : memref<8x64xbf16, #tpu.memory_space<vmem>>, vector<8x64xbf16>
    %cst = arith.constant dense<0.000000e+00> : vector<8x64xf32>
    %2 = tpu.matmul %0, %1, %cst {dimension_numbers = #tpu.dot_dimension_numbers<[1], [0], [0], [1], [0, 0, 1, 1], [], []>} : vector<8x8xbf16>, vector<8x64xbf16>, vector<8x64xf32> -> vector<8x64xf32>
    %3 = vector.extract_strided_slice %2 {offsets = [0, 0], sizes = [8, 32], strides = [1, 1]} : vector<8x64xf32> to vector<8x32xf32>
    %4 = arith.truncf %3 : vector<8x32xf32> to vector<8x32xbf16>
    %c0_3 = arith.constant 0 : index
    %c0_4 = arith.constant 0 : index
    %5 = vector.load %arg3[%c0_3, %c0_4] : memref<32x128xbf16, #tpu.memory_space<vmem>>, vector<32x128xbf16>
    %cst_5 = arith.constant dense<0.000000e+00> : vector<8x128xf32>
    %6 = tpu.matmul %4, %5, %cst_5 {dimension_numbers = #tpu.dot_dimension_numbers<[1], [0], [0], [1], [0, 0, 1, 1], [], []>} : vector<8x32xbf16>, vector<32x128xbf16>, vector<8x128xf32> -> vector<8x128xf32>
    %cst_6 = arith.constant 0.000000e+00 : f32
    %7 = vector.broadcast %cst_6 : f32 to vector<8x128xf32>
    %8 = arith.cmpf ogt, %6, %7 : vector<8x128xf32>
    %cst_7 = arith.constant 0.00999999977 : f32
    %9 = vector.broadcast %cst_7 : f32 to vector<8x128xf32>
    %10 = arith.mulf %9, %6 : vector<8x128xf32>
    %11 = arith.select %8, %6, %10 : vector<8x128xi1>, vector<8x128xf32>
    %c0_8 = arith.constant 0 : index
    %c0_9 = arith.constant 0 : index
    %c0_10 = arith.constant 0 : index
    %12 = vector.load %arg4[%c0_8, %c0_9, %c0_10] : memref<2x8x128xf32, #tpu.memory_space<vmem>>, vector<1x8x128xf32>
    %13 = vector.shape_cast %12 : vector<1x8x128xf32> to vector<8x128xf32>
    %14 = vector.shape_cast %11 : vector<8x128xf32> to vector<1x8x128xf32>
    tpu.vector_store %arg4[%c0_8, %c0_9, %c0_10], %14 {strides = array<i32>} : memref<2x8x128xf32, #tpu.memory_space<vmem>>, vector<1x8x128xf32>,
    %15 = vector.extract_strided_slice %2 {offsets = [0, 32], sizes = [8, 32], strides = [1, 1]} : vector<8x64xf32> to vector<8x32xf32>
    %16 = arith.truncf %15 : vector<8x32xf32> to vector<8x32xbf16>
    %c0_11 = arith.constant 0 : index
    %c0_12 = arith.constant 0 : index
    %17 = vector.load %arg3[%c0_11, %c0_12] : memref<32x128xbf16, #tpu.memory_space<vmem>>, vector<32x128xbf16>
    %cst_13 = arith.constant dense<0.000000e+00> : vector<8x128xf32>
    %18 = tpu.matmul %16, %17, %cst_13 {dimension_numbers = #tpu.dot_dimension_numbers<[1], [0], [0], [1], [0, 0, 1, 1], [], []>} : vector<8x32xbf16>, vector<32x128xbf16>, vector<8x128xf32> -> vector<8x128xf32>
    %cst_14 = arith.constant 0.000000e+00 : f32
    %19 = vector.broadcast %cst_14 : f32 to vector<8x128xf32>
    %20 = arith.cmpf ogt, %18, %19 : vector<8x128xf32>
    %cst_15 = arith.constant 0.00999999977 : f32
    %21 = vector.broadcast %cst_15 : f32 to vector<8x128xf32>
    %22 = arith.mulf %21, %18 : vector<8x128xf32>
    %23 = arith.select %20, %18, %22 : vector<8x128xi1>, vector<8x128xf32>
    %c1 = arith.constant 1 : index
    %c0_16 = arith.constant 0 : index
    %c0_17 = arith.constant 0 : index
    %24 = vector.load %arg4[%c1, %c0_16, %c0_17] : memref<2x8x128xf32, #tpu.memory_space<vmem>>, vector<1x8x128xf32>
    %25 = vector.shape_cast %24 : vector<1x8x128xf32> to vector<8x128xf32>
    %26 = vector.shape_cast %23 : vector<8x128xf32> to vector<1x8x128xf32>
    tpu.vector_store %arg4[%c1, %c0_16, %c0_17], %26 {strides = array<i32>} : memref<2x8x128xf32, #tpu.memory_space<vmem>>, vector<1x8x128xf32>,
    return
  }
  func.func @transform_0(%arg0: i32) -> (i32, i32) {
    %c0_i32 = arith.constant 0 : i32
    %c0_i32_0 = arith.constant 0 : i32
    return %arg0, %c0_i32 : i32, i32
  }
  func.func @transform_1(%arg0: i32) -> (i32, i32) {
    %c0_i32 = arith.constant 0 : i32
    %c0_i32_0 = arith.constant 0 : i32
    %c0_i32_1 = arith.constant 0 : i32
    return %c0_i32, %c0_i32_0 : i32, i32
  }
  func.func @transform_2(%arg0: i32) -> (i32, i32) {
    %c0_i32 = arith.constant 0 : i32
    %c0_i32_0 = arith.constant 0 : i32
    %c0_i32_1 = arith.constant 0 : i32
    return %c0_i32, %c0_i32_0 : i32, i32
  }
  func.func @transform_3(%arg0: i32) -> (i32, i32, i32) {
    %c0_i32 = arith.constant 0 : i32
    %c0_i32_0 = arith.constant 0 : i32
    %c0_i32_1 = arith.constant 0 : i32
    return %c0_i32, %arg0, %c0_i32_0 : i32, i32, i32
  }
}

</mosaic_0001>

<bundles_post_ra>
// kernel: tpu_custom_call.1
= control target key start
LH: loop header
LB: loop body
LE: loop exit
PB: predicated region body
PF: predicated region fallthrough
CT: control target
= control target key end

     0   :  { %8 = vsyncpa [#allocation3], 0  ;;  %s355_s0 = inlined_call_operand.hbm [shape: bf16[8,8], index: 0, kind: input, shape index: {}]   ;;  %s356_s1 = inlined_call_operand.hbm [shape: bf16[8,64], index: 1, kind: input, shape index: {}]   ;;  %s357_s2 = inlined_call_operand.hbm [shape: bf16[32,128], index: 2, kind: input, shape index: {}]   ;;  %s358_s3 = inlined_call_operand.hbm [shape: f32[2,8,128], index: 3, kind: output, shape index: {}]  }
   0x1   :  { %9 = vsyncpa [#allocation6], 0  ;;  %s27_s14 = sshll.u32 %s356_s1, 4  ;;  %s28_s14 = int_to_ptr.hbm [resolvable:$true] %s27_s14 }
   0x2   :  { %10 = vsyncpa [#allocation4], 0  ;;  %s314_s15 = smov [#allocation5]   ;;  %s16_s19 = sshll.u32 %s355_s0, 4  ;;  %s17_s19 = int_to_ptr.hbm [resolvable:$true] %s16_s19 }
   0x3   :  { %s29_s16 = sshll.u32 %s314_s15, 4  ;;  %s315_s20 = smov [#allocation2]   ;;  %s30_s16 = int_to_ptr.vmem [resolvable:$true] %s29_s16 }
   0x4   :  { %32 = dma.hbm_to_vmem [thread:$0]  %s28_s14, 64, %s30_s16, [#allocation6]  }
   0x5   :  { %s18_s21 = sshll.u32 %s315_s20, 4  ;;  %s37_s24 = sshll.u32 %s357_s2, 4  ;;  %s19_s21 = int_to_ptr.vmem [resolvable:$true] %s18_s21  ;;  %s38_s24 = int_to_ptr.hbm [resolvable:$true] %s37_s24 }
   0x6   :  { %21 = dma.hbm_to_vmem [thread:$0]  %s17_s19, 64, %s19_s21, [#allocation3]  }
   0x7   :  { %s316_s1 = smov [#allocation7]   ;;  %s317_s26 = smov 64  }
   0x8   :  { %s39_s25 = sshll.u32 %s316_s1, 4  ;;  %s318_s27 = smov 4   ;;  %s40_s25 = int_to_ptr.vmem [resolvable:$true] %s39_s25 }
   0x9   :  { %45 = dma.hbm_to_vmem [thread:$0]  %s38_s24, 256, %s40_s25, [#allocation6], %s317_s26, %s317_s26, %s318_s27  }
   0xa   :  { %308 = dma.done.wait [#allocation3], 64  }
   0xb   :  { %309 = vsyncadd [#allocation3], 4294967232 }
   0xc   :  { %310 = dma.done.wait [#allocation6], 320  }
   0xd   :  { %311 = vsyncadd [#allocation6], 4294966976  ;;  %vm65_vm0 = vcmask 1043456   ;;  %v60_v0 = vld [vmem:[#allocation5] sm:$0xf]  ;;  %v200_v1 = vld [vmem:[#allocation7 + $0x8] sm:$0xff] }
   0xe   :  { %v67_v2 = vsel %vm65_vm0, %v60_v0, 0  ;;  %v59_v3 = vld [vmem:[#allocation2] sm:$0xf]  ;;  %vm61_vm1 = vcmask 64512   ;;  %109 = vmatpush.bf16.msra.mxu1 %v200_v1  ;;  %v199_v4 = vld [vmem:[#allocation7] sm:$0xff]  ;;  %v202_v5 = vld [vmem:[#allocation7 + $0x8] sm:$0xff] }
   0xf   :  { %76 = vmatpush.bf16.msra.mxu0 %v67_v2  ;;  %148 = vmatpush.bf16.msra.mxu2 %v202_v5  ;;  %v201_v6 = vld [vmem:[#allocation7] sm:$0xff]  ;;  %vm99_vm2 = vcmask 261120   ;;  %s319_s0 = smov 96   ;;  %s320_s2 = smov [#allocation8]  }
  0x10   :  { %s164_s28 = sshll.u32 %s320_s2, 4  ;;  %s166_s4 = sshll.u32 %s358_s3, 4  ;;  %s165_s28 = int_to_ptr.vmem [resolvable:$true] %s164_s28  ;;  %s167_s4 = int_to_ptr.hbm [resolvable:$true] %s166_s4 }
  0x11   :  { %s321_s5 = smov 128   ;;  %s322_s6 = smov 8  }
  0x12   :  { %180 = vmatmul.msk.bf16.vlgmr.msra.gmra.mxu0 %vm61_vm1, %v59_v3  ;;  %110 = vmatpush.bf16.msra.mxu1 %v199_v4 }
  0x13   :  { %149 = vmatpush.bf16.msra.mxu2 %v201_v6 }
  0x8f   :  { %v78_v7 = vpop.f32.mrf.mxu0 }
  0x90   :  { %v82_v8 = vpack.c.bf16 %v78_v7, %v78_v7 }
  0x92   :  { %189 = vmatmul.msk.bf16.vlgmr.msra.gmra.mxu1 %vm99_vm2, %v82_v8  ;;  %125 = vrot.lane.b32.xlu0 %v82_v8, %s319_s0 }
  0x97   :  { %v80_v9 = vpop.f32.mrf.mxu0 }
 0x104   :  { %v126_v10 = vpop.permute.xlu0 %125 }
 0x105   :  { %198 = vmatmul.msk.bf16.vlgmr.msra.gmra.mxu2 %vm99_vm2, %v126_v10 }
 0x10f   :  { %v112_v11 = vpop.f32.mrf.mxu1 }
 0x110   :  { %vm116_vm3 = vcmp.gt.f32.partialorder %v112_v11, 0.0  ;;  %v117_v12 = vmul.f32 0.01, %v112_v11 }
 0x112   :  { %v118_v13 = vsel %vm116_vm3, %v112_v11, %v117_v12 }
 0x113   :  { %119 = vst [vmem:[#allocation8] sm:$0xff] %v118_v13 }
 0x117   :  { %v114_v14 = vpop.f32.mrf.mxu1 }
 0x188   :  { %v151_v15 = vpop.f32.mrf.mxu2 }
 0x189   :  { %vm155_vm4 = vcmp.gt.f32.partialorder %v151_v15, 0.0  ;;  %v156_v16 = vmul.f32 0.01, %v151_v15 }
 0x18b   :  { %v157_v17 = vsel %vm155_vm4, %v151_v15, %v156_v16 }
 0x18c   :  { %159 = vst [vmem:[#allocation8 + $0x8] sm:$0xff] %v157_v17 }
 0x18d   :  { %172 = dma.vmem_to_hbm [thread:$0]  %s165_s28, 256, %s167_s4, [#allocation4], %s321_s5, %s321_s5, %s322_s6  }
 0x190   :  { %v153_v18 = vpop.f32.mrf.mxu2 }
 0x191   :  { %312 = dma.done.wait [#allocation4], 256  }
 0x192   :  { %313 = vsyncadd [#allocation4], 4294967040 }
 0x193   :  { %177 = vsyncpa [#allocation3], 1 }
 0x194   :  { %178 = vsyncpa [#allocation6], 1 }
 0x195   :  { %179 = vsyncpa [#allocation4], 1 }

</bundles_post_ra>
